<compile_context>
chip_gen: v7x
topology: tpu7x:2x2x1
jax: 0.10.0
libtpu: 0.0.40
codegen_flags: <defaults>
</compile_context>

<pallas_src>
import functools

import jax
import jax.numpy as jnp
from jax import lax
from jax.experimental import pallas as pl
from jax.experimental.pallas import tpu as pltpu


BN_EPS = 1e-5          # PyTorch BatchNorm2d default
N_HIDDEN = 256         # fc1 width (fixed by the module)
_UNROLL_C = 16         # python-unroll the channel FMA loop up to this many channels


def _round_up(n, m):
    return ((n + m - 1) // m) * m


def _pick_block_b(B, C, P_pad, *, x_bytes=2, x_budget=16 << 20, cap=2048):
    """Batch-tile rows.

    Multiple of 128 (so the lane-dense (1, block_b) output tile satisfies the (8,128)
    constraint), sized so the double-buffered bf16 x tile fits a 16 MiB VMEM budget on all
    generations, and chosen so the grid has >= 2 steps whenever B > 128 (v7x megacore).
    """
    if B <= 128:
        # Tiny batch: one grid step; the call is launch/prologue-latency bound anyway.
        return _round_up(max(B, 1), 8)
    max_rows = (x_budget // (2 * C * P_pad * x_bytes)) // 128 * 128
    if max_rows < 128:
        # TODO(synk): for very wide backbones (C*P_pad bf16 rows > 64 KiB) add a channel
        # ("arbitrary") grid axis with a VMEM accumulator instead of one-shot channels.
        raise NotImplementedError("C * position_dim too large for a single-pass x tile")
    return min(cap, max_rows, _round_up(pl.cdiv(B, 2), 128))


def value_net_kernel(scal_ref, x_ref, w1_ref, b1_ref, w2_ref, out_ref, *, C, P_pad):
    # scal_ref : SMEM f32[C+2]  [folded conv*BN weight per channel ..., folded bias, fc2 bias]
    # x_ref    : (TB, C*P_pad) bf16   channel c occupies lanes [c*P_pad, (c+1)*P_pad)
    # w1_ref   : (P_pad, 256) bf16
    # b1_ref   : (1, 256) f32
    # w2_ref   : (1, 256) f32
    # out_ref  : (1, TB) f32          lane-dense output row

    # Folded 1x1 conv + BN (eval mode): per-channel scalar FMA over lane-aligned slabs.
    # Slabs are upcast to f32 (required on v5e, which has no bf16 VALU; cheap everywhere).
    if C <= _UNROLL_C:
        y = scal_ref[0] * x_ref[:, 0:P_pad].astype(jnp.float32)
        for c in range(1, C):
            y = y + scal_ref[c] * x_ref[:, c * P_pad:(c + 1) * P_pad].astype(jnp.float32)
    else:
        def body(c, acc):
            start = pl.multiple_of(c * P_pad, 128)
            slab = x_ref[:, pl.ds(start, P_pad)].astype(jnp.float32)
            return acc + scal_ref[c] * slab
        y0 = scal_ref[0] * x_ref[:, 0:P_pad].astype(jnp.float32)
        y = lax.fori_loop(1, C, body, y0, unroll=8)

    y = y + scal_ref[C]                                   # folded conv/BN bias
    z = jnp.maximum(y, 0.0).astype(jnp.bfloat16)          # ReLU            (TB, P_pad)

    # fc1 on the MXU: bf16 x bf16 with f32 accumulation.
    h = jnp.dot(z, w1_ref[...], preferred_element_type=jnp.float32) + b1_ref[...]
    h = jnp.maximum(h, 0.0)                               # ReLU            (TB, 256) f32

    # fc2 (256 -> 1) as a lane-dense (1, TB) row on the MXU (contract the last dims).
    o = lax.dot_general(w2_ref[...], h, (((1,), (1,)), ((), ())),
                        preferred_element_type=jnp.float32) + scal_ref[C + 1]
    out_ref[...] = jnp.tanh(o)                            # (1, TB) in [-1, 1]


def value_net_forward(x_nchw, params, *, block_b=None):
    """x_nchw: f32[B, C, H, W]  ->  f32[B, 1]"""
    B, C, H, W = x_nchw.shape
    P = H * W
    N1 = params["w1t"].shape[1]                           # 256
    assert P == params["w1t"].shape[0], "position_dim mismatch"
    P_pad = _round_up(P, 128)                             # lane-align each channel slab

    # --- host-side folding of BatchNorm2d(1) (eval mode) + conv bias ---
    scale = params["bn_gamma"] * lax.rsqrt(params["bn_var"] + BN_EPS)
    w_fold = (params["conv_w"][:, 0] * scale).astype(jnp.float32)            # (C,)
    b_fold = (params["conv_b"] - params["bn_mean"]) * scale + params["bn_beta"]
    scalars = jnp.concatenate([
        w_fold,
        jnp.reshape(b_fold, (1,)).astype(jnp.float32),
        params["b2"].reshape(1).astype(jnp.float32),
    ])                                                                        # f32[C+2]

    # --- layout: NCHW -> (B, C*P_pad) bf16, channels lane-aligned; pad batch to tile ---
    if block_b is None:
        block_b = _pick_block_b(B, C, P_pad)
    B_pad = _round_up(B, block_b)
    x = x_nchw.reshape(B, C, P)
    if P_pad != P:
        x = jnp.pad(x, ((0, 0), (0, 0), (0, P_pad - P)))
    x = x.reshape(B, C * P_pad).astype(jnp.bfloat16)      # bf16 stream: half the HBM bytes
    if B_pad != B:
        x = jnp.pad(x, ((0, B_pad - B), (0, 0)))

    w1 = params["w1t"].astype(jnp.bfloat16)               # (P, 256) bf16 weights
    if P_pad != P:
        w1 = jnp.pad(w1, ((0, P_pad - P), (0, 0)))        # zero rows -> padded lanes inert
    b1 = params["b1"].reshape(1, N1).astype(jnp.float32)  # (1, 256)
    w2 = params["w2t"].reshape(1, N1).astype(jnp.float32) # (1, 256) row

    kernel = functools.partial(value_net_kernel, C=C, P_pad=P_pad)
    grid = (B_pad // block_b,)

    flops = 2 * B_pad * (C * P_pad + P_pad * N1 + N1)
    bytes_accessed = int(x.size * 2 + w1.size * 2 + b1.size * 4 + w2.size * 4
                         + scalars.size * 4 + B_pad * 4)

    # VMEM budget: double-buffered x + resident weights + body temporaries, plus margin.
    # Capped at 48 MiB, safe on v5e/v6e (128 MiB physical) and v7x (64 MiB physical).
    vmem_need = (2 * block_b * C * P_pad * 2              # x, bf16, double-buffered
                 + 2 * (P_pad * N1 * 2 + 2 * N1 * 4)      # weights (worst case x2)
                 + 2 * block_b * 4                        # (1, block_b) output
                 + block_b * (6 * P_pad + 6 * N1))        # y/z/h temporaries
    vmem_limit_bytes = int(min(48 << 20, max(20 << 20, vmem_need + (8 << 20))))

    out = pl.pallas_call(
        kernel,
        out_shape=jax.ShapeDtypeStruct((1, B_pad), jnp.float32),
        grid=grid,
        in_specs=[
            pl.BlockSpec(memory_space=pltpu.MemorySpace.SMEM),     # folded scalars
            pl.BlockSpec((block_b, C * P_pad), lambda i: (i, 0)),  # x (pipelined)
            pl.BlockSpec((P_pad, N1), lambda i: (0, 0)),           # w1 (resident)
            pl.BlockSpec((1, N1), lambda i: (0, 0)),               # b1 (resident)
            pl.BlockSpec((1, N1), lambda i: (0, 0)),               # w2 row (resident)
        ],
        out_specs=pl.BlockSpec((1, block_b), lambda i: (0, i)),    # lane-dense output
        compiler_params=pltpu.CompilerParams(
            dimension_semantics=("parallel",),
            vmem_limit_bytes=vmem_limit_bytes),
        cost_estimate=pl.CostEstimate(
            flops=flops, transcendentals=B_pad, bytes_accessed=bytes_accessed),
    )(scalars, x, w1, b1, w2)

    return out[0, :B].reshape(B, 1)


def make_params(key, inplanes, position_dim):
    ks = jax.random.split(key, 6)
    return {
        # nn.Conv2d(inplanes, 1, kernel_size=1): weight (1, C, 1, 1) -> stored as (C, 1)
        "conv_w": 0.1 * jax.random.normal(ks[0], (inplanes, 1), jnp.float32),
        "conv_b": jnp.float32(0.05),
        # nn.BatchNorm2d(1) running stats + affine params (eval mode)
        "bn_gamma": jnp.float32(1.1),
        "bn_beta": jnp.float32(-0.02),
        "bn_mean": jnp.float32(0.03),
        "bn_var": jnp.float32(0.9),
        # nn.Linear(position_dim, 256): weight (256, P) -> stored transposed (P, 256)
        "w1t": 0.05 * jax.random.normal(ks[1], (position_dim, 256), jnp.float32),
        "b1": 0.01 * jax.random.normal(ks[2], (1, 256), jnp.float32),
        # nn.Linear(256, 1): weight (1, 256) -> stored transposed (256, 1)
        "w2t": 0.05 * jax.random.normal(ks[3], (256, 1), jnp.float32),
        "b2": 0.01 * jax.random.normal(ks[4], (1, 1), jnp.float32),
    }


def value_net_reference(x_nchw, params):
    """Pure-JAX f32 reference mirroring the PyTorch forward (eval-mode BN)."""
    B, C, H, W = x_nchw.shape
    P = H * W
    y = jnp.einsum("bchw,c->bhw", x_nchw, params["conv_w"][:, 0]) + params["conv_b"]
    z = (y - params["bn_mean"]) * (params["bn_gamma"] /
                                   jnp.sqrt(params["bn_var"] + BN_EPS)) + params["bn_beta"]
    z = jax.nn.relu(z).reshape(B, P)
    h = jax.nn.relu(z @ params["w1t"] + params["b1"])
    return jnp.tanh(h @ params["w2t"] + params["b2"])


if __name__ == "__main__":
    key = jax.random.PRNGKey(0)
    k_x, k_p = jax.random.split(key)

    B, C, H, W = 2, 4, 16, 16           # inplanes=4, position_dim=H*W=256
    position_dim = H * W

    x = jax.random.normal(k_x, (B, C, H, W), jnp.float32)
    params = make_params(k_p, C, position_dim)

    out = value_net_forward(x, params)
    out = jax.block_until_ready(out)

    ref = value_net_reference(x, params)
    assert out.shape == (B, 1)
    assert jnp.all(jnp.isfinite(out))
    # x stream + fc1 run in bf16 (f32 accumulation); agreement with f32 reference is ~1e-3.
    assert jnp.max(jnp.abs(out - ref)) < 1e-2, "mismatch vs JAX reference"

    print("KERNEL_OK")
</pallas_src>

<mosaic_0001>
module attributes {stable_mosaic.version = 11 : i64} {
  func.func @value_net_kernel(%arg0: i32, %arg1: memref<6xf32, #tpu.memory_space<smem>>, %arg2: memref<8x1024xbf16, #tpu.memory_space<vmem>>, %arg3: memref<256x256xbf16, #tpu.memory_space<vmem>>, %arg4: memref<1x256xf32, #tpu.memory_space<vmem>>, %arg5: memref<1x256xf32, #tpu.memory_space<vmem>>, %arg6: memref<1x8xf32, #tpu.memory_space<vmem>>) attributes {dimension_semantics = [#tpu.dimension_semantics<parallel>], iteration_bounds = array<i64: 1>, scalar_prefetch = 0 : i64, scratch_operands = 0 : i64, tpu.core_type = #tpu.core_type<tc>, window_params = [{transform_indices = @transform_0, window_bounds = array<i64: 6>}, {transform_indices = @transform_1, window_bounds = array<i64: 8, 1024>}, {pipeline_mode = #tpu.pipeline_mode<synchronous>, transform_indices = @transform_2, window_bounds = array<i64: 256, 256>}, {pipeline_mode = #tpu.pipeline_mode<synchronous>, transform_indices = @transform_3, window_bounds = array<i64: 1, 256>}, {pipeline_mode = #tpu.pipeline_mode<synchronous>, transform_indices = @transform_4, window_bounds = array<i64: 1, 256>}, {transform_indices = @transform_5, window_bounds = array<i64: 1, 8>}]} {
    %c0 = arith.constant 0 : index
    %0 = memref.load %arg1[%c0] : memref<6xf32, #tpu.memory_space<smem>>
    %c0_0 = arith.constant 0 : index
    %c0_1 = arith.constant 0 : index
    %1 = vector.load %arg2[%c0_0, %c0_1] : memref<8x1024xbf16, #tpu.memory_space<vmem>>, vector<8x256xbf16>
    %2 = arith.extf %1 : vector<8x256xbf16> to vector<8x256xf32>
    %3 = vector.broadcast %0 : f32 to vector<8x256xf32>
    %4 = arith.mulf %3, %2 : vector<8x256xf32>
    %c1 = arith.constant 1 : index
    %5 = memref.load %arg1[%c1] : memref<6xf32, #tpu.memory_space<smem>>
    %c0_2 = arith.constant 0 : index
    %c256 = arith.constant 256 : index
    %6 = vector.load %arg2[%c0_2, %c256] : memref<8x1024xbf16, #tpu.memory_space<vmem>>, vector<8x256xbf16>
    %7 = arith.extf %6 : vector<8x256xbf16> to vector<8x256xf32>
    %8 = vector.broadcast %5 : f32 to vector<8x256xf32>
    %9 = arith.mulf %8, %7 : vector<8x256xf32>
    %10 = arith.addf %4, %9 : vector<8x256xf32>
    %c2 = arith.constant 2 : index
    %11 = memref.load %arg1[%c2] : memref<6xf32, #tpu.memory_space<smem>>
    %c0_3 = arith.constant 0 : index
    %c512 = arith.constant 512 : index
    %12 = vector.load %arg2[%c0_3, %c512] : memref<8x1024xbf16, #tpu.memory_space<vmem>>, vector<8x256xbf16>
    %13 = arith.extf %12 : vector<8x256xbf16> to vector<8x256xf32>
    %14 = vector.broadcast %11 : f32 to vector<8x256xf32>
    %15 = arith.mulf %14, %13 : vector<8x256xf32>
    %16 = arith.addf %10, %15 : vector<8x256xf32>
    %c3 = arith.constant 3 : index
    %17 = memref.load %arg1[%c3] : memref<6xf32, #tpu.memory_space<smem>>
    %c0_4 = arith.constant 0 : index
    %c768 = arith.constant 768 : index
    %18 = vector.load %arg2[%c0_4, %c768] : memref<8x1024xbf16, #tpu.memory_space<vmem>>, vector<8x256xbf16>
    %19 = arith.extf %18 : vector<8x256xbf16> to vector<8x256xf32>
    %20 = vector.broadcast %17 : f32 to vector<8x256xf32>
    %21 = arith.mulf %20, %19 : vector<8x256xf32>
    %22 = arith.addf %16, %21 : vector<8x256xf32>
    %c4 = arith.constant 4 : index
    %23 = memref.load %arg1[%c4] : memref<6xf32, #tpu.memory_space<smem>>
    %24 = vector.broadcast %23 : f32 to vector<8x256xf32>
    %25 = arith.addf %22, %24 : vector<8x256xf32>
    %cst = arith.constant 0.000000e+00 : f32
    %26 = vector.broadcast %cst : f32 to vector<8x256xf32>
    %27 = arith.maximumf %25, %26 : vector<8x256xf32>
    %28 = arith.truncf %27 : vector<8x256xf32> to vector<8x256xbf16>
    %c0_5 = arith.constant 0 : index
    %c0_6 = arith.constant 0 : index
    %29 = vector.load %arg3[%c0_5, %c0_6] : memref<256x256xbf16, #tpu.memory_space<vmem>>, vector<256x256xbf16>
    %cst_7 = arith.constant dense<0.000000e+00> : vector<8x256xf32>
    %30 = tpu.matmul %28, %29, %cst_7 {dimension_numbers = #tpu.dot_dimension_numbers<[1], [0], [0], [1], [0, 0, 1, 1], [], []>} : vector<8x256xbf16>, vector<256x256xbf16>, vector<8x256xf32> -> vector<8x256xf32>
    %c0_8 = arith.constant 0 : index
    %c0_9 = arith.constant 0 : index
    %31 = vector.load %arg4[%c0_8, %c0_9] : memref<1x256xf32, #tpu.memory_space<vmem>>, vector<1x256xf32>
    %32 = vector.broadcast %31 : vector<1x256xf32> to vector<8x256xf32>
    %33 = arith.addf %30, %32 : vector<8x256xf32>
    %cst_10 = arith.constant 0.000000e+00 : f32
    %34 = vector.broadcast %cst_10 : f32 to vector<8x256xf32>
    %35 = arith.maximumf %33, %34 : vector<8x256xf32>
    %c0_11 = arith.constant 0 : index
    %c0_12 = arith.constant 0 : index
    %36 = vector.load %arg5[%c0_11, %c0_12] : memref<1x256xf32, #tpu.memory_space<vmem>>, vector<1x256xf32>
    %cst_13 = arith.constant dense<0.000000e+00> : vector<1x8xf32>
    %37 = tpu.matmul %36, %35, %cst_13 {dimension_numbers = #tpu.dot_dimension_numbers<[1], [1], [0], [0], [0, 0, 1, 0], [], []>} : vector<1x256xf32>, vector<8x256xf32>, vector<1x8xf32> -> vector<1x8xf32>
    %c5 = arith.constant 5 : index
    %38 = memref.load %arg1[%c5] : memref<6xf32, #tpu.memory_space<smem>>
    %39 = vector.broadcast %38 : f32 to vector<1x8xf32>
    %40 = arith.addf %37, %39 : vector<1x8xf32>
    %41 = math.tanh %40 : vector<1x8xf32>
    %c0_14 = arith.constant 0 : index
    %c0_15 = arith.constant 0 : index
    %42 = vector.load %arg6[%c0_14, %c0_15] : memref<1x8xf32, #tpu.memory_space<vmem>>, vector<1x8xf32>
    tpu.vector_store %arg6[%c0_14, %c0_15], %41 {strides = array<i32>} : memref<1x8xf32, #tpu.memory_space<vmem>>, vector<1x8xf32>,
    return
  }
  func.func @transform_0(%arg0: i32) -> i32 {
    %c0_i32 = arith.constant 0 : i32
    %c0_i32_0 = arith.constant 0 : i32
    return %c0_i32 : i32
  }
  func.func @transform_1(%arg0: i32) -> (i32, i32) {
    %c0_i32 = arith.constant 0 : i32
    %c0_i32_0 = arith.constant 0 : i32
    return %arg0, %c0_i32 : i32, i32
  }
  func.func @transform_2(%arg0: i32) -> (i32, i32) {
    %c0_i32 = arith.constant 0 : i32
    %c0_i32_0 = arith.constant 0 : i32
    %c0_i32_1 = arith.constant 0 : i32
    return %c0_i32, %c0_i32_0 : i32, i32
  }
  func.func @transform_3(%arg0: i32) -> (i32, i32) {
    %c0_i32 = arith.constant 0 : i32
    %c0_i32_0 = arith.constant 0 : i32
    %c0_i32_1 = arith.constant 0 : i32
    return %c0_i32, %c0_i32_0 : i32, i32
  }
  func.func @transform_4(%arg0: i32) -> (i32, i32) {
    %c0_i32 = arith.constant 0 : i32
    %c0_i32_0 = arith.constant 0 : i32
    %c0_i32_1 = arith.constant 0 : i32
    return %c0_i32, %c0_i32_0 : i32, i32
  }
  func.func @transform_5(%arg0: i32) -> (i32, i32) {
    %c0_i32 = arith.constant 0 : i32
    %c0_i32_0 = arith.constant 0 : i32
    return %c0_i32, %arg0 : i32, i32
  }
}

</mosaic_0001>

<bundles_post_ra>
// kernel: tpu_custom_call.1
= control target key start
LH: loop header
LB: loop body
LE: loop exit
PB: predicated region body
PF: predicated region fallthrough
CT: control target
= control target key end

     0   :  { %10 = vsyncpa [#allocation5], 0  ;;  %s733_s0 = inlined_call_operand.hbm [shape: f32[6], index: 0, kind: input, shape index: {}]   ;;  %s734_s1 = inlined_call_operand.hbm [shape: bf16[8,1024], index: 1, kind: input, shape index: {}]   ;;  %s735_s2 = inlined_call_operand.hbm [shape: bf16[256,256], index: 2, kind: input, shape index: {}]   ;;  %s736_s3 = inlined_call_operand.vmem [shape: f32[1,256], index: 3, kind: input, shape index: {}]   ;;  %s737_s4 = inlined_call_operand.vmem [shape: f32[1,256], index: 4, kind: input, shape index: {}]   ;;  %s738_s5 = inlined_call_operand.hbm [shape: f32[1,8], index: 5, kind: output, shape index: {}]  }
   0x1   :  { %11 = vsyncpa [#allocation3], 0 }
   0x2   :  { %12 = vsyncpa [#allocation8], 0 }
   0x3   :  { %13 = vsyncpa [#allocation4], 0  ;;  %s544_s20 = scalar_lea.hbm %s733_s0, 16 }
   0x4   :  { %p545_p0 = scmp.ne.s32.totalorder %s733_s0, %s544_s20  ;;  %p548_p1 = scmp.lt.u32.totalorder %s544_s20, %s733_s0 }
   0x6   :  { %p550_p2 = pnand %p548_p1, %p545_p0 }
   0x8   :  { %553 = shalt.err (!%p550_p2)
}
   0x9   :  { %s628_s25 = smov [#allocation2]   ;;  %s629_s28 = smov [#allocation6]  }
   0xa   :  { %21 = dma.hbm_to_smem %s733_s0, 16, %s628_s25, [#allocation5]  }
   0xb   :  { %s28_s29 = sshll.u32 %s629_s28, 4  ;;  %s630_s30 = smov [#allocation7]   ;;  %s29_s29 = int_to_ptr.vmem [resolvable:$true] %s28_s29 }
   0xc   :  { %s37_s6 = sshll.u32 %s630_s30, 4  ;;  %s554_s9 = scalar_lea.hbm %s734_s1, 512  ;;  %s38_s6 = int_to_ptr.vmem [resolvable:$true] %s37_s6 }
   0xd   :  { %p555_p3 = scmp.ne.s32.totalorder %s734_s1, %s554_s9  ;;  %p558_p4 = scmp.lt.u32.totalorder %s554_s9, %s734_s1 }
   0xf   :  { %p560_p5 = pnand %p558_p4, %p555_p3 }
  0x11   :  { %563 = shalt.err (!%p560_p5)
}
  0x12   :  { %s564_s0 = scalar_lea.vmem %s29_s29, 512  ;;  %p569_p7 = scmp.lt.s32.totalorder %s29_s29, %s29_s29 }
  0x13   :  { %p565_p6 = scmp.ne.s32.totalorder %s29_s29, %s564_s0  ;;  %p570_p8 = scmp.lt.s32.totalorder %s564_s0, %s564_s0 }
  0x15   :  { %p571_p9 = por %p570_p8, %p569_p7 }
  0x17   :  { %p572_p10 = pnand %p571_p9, %p565_p6 }
  0x19   :  { %575 = shalt.err (!%p572_p10)
}
  0x1a   :  { %31 = dma.hbm_to_vmem [thread:$0]  %s734_s1, 512, %s29_s29, [#allocation3]  }
  0x1b   :  { %s576_s18 = scalar_lea.hbm %s735_s2, 4096 }
  0x1c   :  { %p577_p11 = scmp.ne.s32.totalorder %s735_s2, %s576_s18  ;;  %p580_p12 = scmp.lt.u32.totalorder %s576_s18, %s735_s2 }
  0x1e   :  { %p582_p13 = pnand %p580_p12, %p577_p11 }
  0x20   :  { %585 = shalt.err (!%p582_p13)
}
  0x21   :  { %s586_s23 = scalar_lea.vmem %s38_s6, 4096  ;;  %p591_p1 = scmp.lt.s32.totalorder %s38_s6, %s38_s6 }
  0x22   :  { %p587_p0 = scmp.ne.s32.totalorder %s38_s6, %s586_s23  ;;  %p592_p2 = scmp.lt.s32.totalorder %s586_s23, %s586_s23 }
  0x24   :  { %p593_p3 = por %p592_p2, %p591_p1 }
  0x26   :  { %p594_p4 = pnand %p593_p3, %p587_p0 }
  0x28   :  { %597 = shalt.err (!%p594_p4)
}
  0x29   :  { %s631_s1 = smov 128   ;;  %s632_s24 = smov 8  }
  0x2a   :  { %43 = dma.hbm_to_vmem [thread:$0]  %s735_s2, 4096, %s38_s6, [#allocation8], %s631_s1, %s631_s1, %s632_s24  }
  0x2b   :  { %620 = dma.done.wait [#allocation5], 16  }
  0x2c   :  { %621 = vsyncadd [#allocation5], 4294967280 }
  0x2d   :  { %622 = dma.done.wait [#allocation3], 512  }
  0x2e   :  { %623 = vsyncadd [#allocation3], 4294966784 }
  0x2f   :  { %624 = dma.done.wait [#allocation8], 4096  }
  0x30   :  { %625 = vsyncadd [#allocation8], 4294963200 }
  0x31   :  { %57 = sfence }
  0x32   :  { %v494_v0 = vld [vmem:[#allocation7 + $0x4] ss:$8 sps:$4 sm:$0xff]   ;;  %v496_v1 = vld [vmem:[#allocation7] ss:$8 sps:$4 sm:$0xff]   ;;  %v497_v2 = vld [vmem:[#allocation7 + $0x14] ss:$8 sps:$4 sm:$0xff]  }
  0x33   :  { %304 = vmatprep.subr.bf16.mxu0 %v494_v0  ;;  %v499_v3 = vld [vmem:[#allocation7 + $0x10] ss:$8 sps:$4 sm:$0xff]   ;;  %v500_v4 = vld [vmem:[#allocation7 + $0x24] ss:$8 sps:$4 sm:$0xff]   ;;  %v502_v5 = vld [vmem:[#allocation7 + $0x20] ss:$8 sps:$4 sm:$0xff]  }
  0x34   :  { %305 = vmatpush1.bf16.msra.mxu0 %v496_v1  ;;  %v503_v6 = vld [vmem:[#allocation7 + $0x34] ss:$8 sps:$4 sm:$0xff]   ;;  %v505_v7 = vld [vmem:[#allocation7 + $0x30] ss:$8 sps:$4 sm:$0xff]   ;;  %v506_v8 = vld [vmem:[#allocation7 + $0x44] ss:$8 sps:$4 sm:$0xff]  }
  0x35   :  { %306 = vmatprep.subr.bf16.mxu0 %v497_v2  ;;  %s700_s2 = sld [smem:[#allocation2]]  ;;  %s702_s27 = sld [smem:[#allocation2 + $0x1]]  ;;  %v508_v9 = vld [vmem:[#allocation7 + $0x40] ss:$8 sps:$4 sm:$0xff]   ;;  %v509_v10 = vld [vmem:[#allocation7 + $0x54] ss:$8 sps:$4 sm:$0xff]  }
  0x36   :  { %s704_s28 = sld [smem:[#allocation2 + $0x2]]  ;;  %s706_s29 = sld [smem:[#allocation2 + $0x3]]  ;;  %v511_v11 = vld [vmem:[#allocation7 + $0x50] ss:$8 sps:$4 sm:$0xff]   ;;  %v512_v12 = vld [vmem:[#allocation7 + $0x64] ss:$8 sps:$4 sm:$0xff]  }
  0x37   :  { %v59_v13 = vld [vmem:[#allocation6] sm:$0xff]  ;;  %v66_v15 = vld [vmem:[#allocation6 + $0x8] sm:$0xff]  ;;  %s710_s30 = sld [smem:[#allocation2 + $0x4]]  ;;  %v75_v19 = vld [vmem:[#allocation6 + $0x10] sm:$0xff]  ;;  %vm432_vm0 = vcmask 57344  }
  0x38   :  { %307 = vmatpush1.bf16.msra.mxu0 %v499_v3  ;;  %v61_v17 = vunpack.c.h.bf16 %v59_v13  ;;  %v68_v18 = vunpack.c.h.bf16 %v66_v15  ;;  %v84_v21 = vld [vmem:[#allocation6 + $0x18] sm:$0xff]  ;;  %v514_v22 = vld [vmem:[#allocation7 + $0x60] ss:$8 sps:$4 sm:$0xff]   ;;  %v77_v23 = vunpack.c.h.bf16 %v75_v19  ;;  %v518_v33 = vld [vmem:[#allocation7 + $0x84] ss:$8 sps:$4 sm:$0xff]   ;;  %v60_v40 = vunpack.c.l.bf16 %v59_v13 }
  0x39   :  { %308 = vmatprep.subr.bf16.mxu0 %v500_v4  ;;  %v86_v24 = vunpack.c.h.bf16 %v84_v21  ;;  %v515_v26 = vld [vmem:[#allocation7 + $0x74] ss:$8 sps:$4 sm:$0xff]   ;;  %v517_v32 = vld [vmem:[#allocation7 + $0x70] ss:$8 sps:$4 sm:$0xff]   ;;  %v520_v37 = vld [vmem:[#allocation7 + $0x80] ss:$8 sps:$4 sm:$0xff]   ;;  %v67_v41 = vunpack.c.l.bf16 %v66_v15  ;;  %v76_v48 = vunpack.c.l.bf16 %v75_v19  ;;  %v85_v53 = vunpack.c.l.bf16 %v84_v21 }
  0x3a   :  { %v521_v38 = vld [vmem:[#allocation7 + $0x94] ss:$8 sps:$4 sm:$0xff]   ;;  %v523_v43 = vld [vmem:[#allocation7 + $0x90] ss:$8 sps:$4 sm:$0xff]   ;;  %v524_v44 = vld [vmem:[#allocation7 + $0xa4] ss:$8 sps:$4 sm:$0xff]  }
  0x3b   :  { %v62_v14 = vstv %s700_s2  ;;  %v69_v16 = vstv %s702_s27  ;;  %v526_v49 = vld [vmem:[#allocation7 + $0xa0] ss:$8 sps:$4 sm:$0xff]   ;;  %v527_v50 = vld [vmem:[#allocation7 + $0xb4] ss:$8 sps:$4 sm:$0xff]   ;;  %v529_v54 = vld [vmem:[#allocation7 + $0xb0] ss:$8 sps:$4 sm:$0xff]  }
  0x3c   :  { %309 = vmatpush1.bf16.msra.mxu0 %v502_v5  ;;  %v78_v20 = vstv %s704_s28  ;;  %v87_v25 = vstv %s706_s29  ;;  %v64_v27 = vmul.f32 %v62_v14, %v61_v17  ;;  %v71_v28 = vmul.f32 %v69_v16, %v68_v18  ;;  %v530_v55 = vld [vmem:[#allocation7 + $0xc4] ss:$8 sps:$4 sm:$0xff]   ;;  %v532_v58 = vld [vmem:[#allocation7 + $0xc0] ss:$8 sps:$4 sm:$0xff]   ;;  %v533_v59 = vld [vmem:[#allocation7 + $0xd4] ss:$8 sps:$4 sm:$0xff]  }
  0x3d   :  { %310 = vmatprep.subr.bf16.mxu0 %v503_v6  ;;  %v80_v29 = vmul.f32 %v78_v20, %v77_v23  ;;  %v89_v31 = vmul.f32 %v87_v25, %v86_v24  ;;  %v93_v35 = vstv %s710_s30  ;;  %v63_v46 = vmul.f32 %v62_v14, %v60_v40  ;;  %v535_v61 = vld [vmem:[#allocation7 + $0xd0] ss:$8 sps:$4 sm:$0xff]   ;;  %v536_v62 = vld [vmem:[#allocation7 + $0xe4] ss:$8 sps:$4 sm:$0xff]   ;;  %v538_v0 = vld [vmem:[#allocation7 + $0xe0] ss:$8 sps:$4 sm:$0xff]  }
  0x3e   :  { %v73_v30 = vadd.f32 %v71_v28, %v64_v27  ;;  %v70_v47 = vmul.f32 %v69_v16, %v67_v41  ;;  %v79_v52 = vmul.f32 %v78_v20, %v76_v48  ;;  %v88_v57 = vmul.f32 %v87_v25, %v85_v53  ;;  %v539_v1 = vld [vmem:[#allocation7 + $0xf4] ss:$8 sps:$4 sm:$0xff]   ;;  %v541_v3 = vld [vmem:[#allocation7 + $0xf0] ss:$8 sps:$4 sm:$0xff]  }
  0x3f   :  { %v134_v5 = vlaneseq }
  0x40   :  { %311 = vmatpush1.bf16.msra.mxu0 %v505_v7  ;;  %v82_v34 = vadd.f32 %v80_v29, %v73_v30  ;;  %v72_v51 = vadd.f32 %v70_v47, %v63_v46 }
  0x41   :  { %312 = vmatprep.subr.bf16.mxu0 %v506_v8  ;;  %v135_v6 = vshrl.u32 %v134_v5, 7  ;;  %v347_v8 = vld [vmem:[%s737_s4] sm:$0x3]  ;;  %s487_s4 = sld [smem:[#allocation2 + $0x5]] }
  0x42   :  { %v91_v36 = vadd.f32 %v89_v31, %v82_v34  ;;  %v81_v56 = vadd.f32 %v79_v52, %v72_v51 }
  0x43   :  { %v140_v7 = vsub.s32 1, %v135_v6 }
  0x44   :  { %313 = vmatpush1.bf16.msra.mxu0 %v508_v9  ;;  %v95_v39 = vadd.f32 %v93_v35, %v91_v36  ;;  %v90_v60 = vadd.f32 %v88_v57, %v81_v56 }
  0x45   :  { %314 = vmatprep.subr.bf16.mxu0 %v509_v10  ;;  %v358_v9 = vrot.slane %v347_v8, %v140_v7  ;;  %v136_v10 = vsub.s32 0, %v135_v6 }
  0x46   :  { %v97_v42 = vmax.f32 %v95_v39, 0.0  ;;  %v94_v63 = vadd.f32 %v93_v35, %v90_v60 }
  0x47   :  { %425 = vmatprep.mubr.f32.mxu1 %v358_v9  ;;  %v349_v23 = vstv %s487_s4 }
  0x48   :  { %315 = vmatpush1.bf16.msra.mxu0 %v511_v11  ;;  %v99_v45 = vpack.c.bf16 %v97_v42, %v97_v42  ;;  %v96_v2 = vmax.f32 %v94_v63, 0.0  ;;  %v132_v11 = vld [vmem:[%s736_s3] sm:$0x3]  ;;  %s633_s3 = smov [#allocation9]  }
  0x49   :  { %316 = vmatprep.subr.bf16.mxu0 %v512_v12  ;;  %v137_v12 = vrot.slane %v132_v11, %v136_v10  ;;  %v141_v13 = vrot.slane %v132_v11, %v140_v7  ;;  %s440_s10 = sshll.u32 %s633_s3, 4  ;;  %s441_s10 = int_to_ptr.vmem [resolvable:$true] %s440_s10 }
  0x4a   :  { %336 = vmatprep.mubr.bf16.mxu0 %v99_v45  ;;  %v98_v4 = vpack.c.bf16 %v96_v2, %v96_v2  ;;  %s598_s11 = scalar_lea.vmem %s441_s10, 16  ;;  %s602_s12 = scalar_lea.vmem %s441_s10, 32 }
  0x4b   :  { %p599_p5 = scmp.ne.s32.totalorder %s441_s10, %s598_s11  ;;  %p603_p6 = scmp.lt.s32.totalorder %s441_s10, %s441_s10 }
  0x4c   :  { %317 = vmatpush1.bf16.msra.mxu0 %v514_v22  ;;  %v354_v22 = vrot.slane %v347_v8, %v136_v10  ;;  %p604_p7 = scmp.lt.s32.totalorder %s602_s12, %s598_s11 }
  0x4d   :  { %318 = vmatprep.subr.bf16.mxu0 %v515_v26 }
  0x4e   :  { %p605_p8 = por %p604_p7, %p603_p6 }
  0x50   :  { %319 = vmatpush1.bf16.msra.mxu0 %v517_v32  ;;  %p606_p9 = pnand %p605_p8, %p599_p5 }
  0x51   :  { %320 = vmatprep.subr.bf16.mxu0 %v518_v33 }
  0x54   :  { %321 = vmatpush1.bf16.msra.mxu0 %v520_v37 }
  0x55   :  { %322 = vmatprep.subr.bf16.mxu0 %v521_v38 }
  0x58   :  { %323 = vmatpush1.bf16.msra.mxu0 %v523_v43 }
  0x59   :  { %324 = vmatprep.subr.bf16.mxu0 %v524_v44 }
  0x5c   :  { %325 = vmatpush1.bf16.msra.mxu0 %v526_v49 }
  0x5d   :  { %326 = vmatprep.subr.bf16.mxu0 %v527_v50 }
  0x60   :  { %327 = vmatpush1.bf16.msra.mxu0 %v529_v54 }
  0x61   :  { %328 = vmatprep.subr.bf16.mxu0 %v530_v55 }
  0x64   :  { %329 = vmatpush1.bf16.msra.mxu0 %v532_v58 }
  0x65   :  { %330 = vmatprep.subr.bf16.mxu0 %v533_v59 }
  0x68   :  { %331 = vmatpush1.bf16.msra.mxu0 %v535_v61 }
  0x69   :  { %332 = vmatprep.subr.bf16.mxu0 %v536_v62 }
  0x6c   :  { %333 = vmatpush1.bf16.msra.mxu0 %v538_v0 }
  0x6d   :  { %334 = vmatprep.subr.bf16.mxu0 %v539_v1 }
  0x70   :  { %335 = vmatpush1.bf16.msra.mxu0 %v541_v3 }
  0x73   :  { %337 = vmatmul.mubr.bf16.vlgmr.msra.gmra.mrb[0].mxu0 %v98_v4 }
 0x146   :  { %v338_v14 = vpop.f32.mrb[0].mxu0 }
 0x147   :  { %v339_v15 = vadd.f32 %v338_v14, %v137_v12  ;;  %v340_v16 = vpop.f32.mrb[1].mxu0 }
 0x148   :  { %v342_v17 = vpop.f32.mrb[2].mxu0  ;;  %v341_v18 = vadd.f32 %v340_v16, %v141_v13 }
 0x149   :  { %v343_v19 = vpop.f32.mrb[3].mxu0  ;;  %v345_v21 = vmax.f32 %v339_v15, 0.0 }
 0x14a   :  { %v346_v20 = vmax.f32 %v341_v18, 0.0 }
 0x14c   :  { %361 = vmatprep.subr.mxu1 %v346_v20 }
 0x14d   :  { %362 = vmatpush1.xpose.msra.mxu1 %v345_v21 }
 0x150   :  { %426 = vmatmul.mubr.f32.vlgmr.msra.gmra.mrb[0].mxu1 %v354_v22 }
 0x223   :  { %v427_v24 = vpop.f32.mrb[0].mxu1 }
 0x224   :  { %v428_v25 = vadd.f32 %v427_v24, %v349_v23  ;;  %v429_v26 = vpop.f32.mrb[1].mxu1 }
 0x226   :  { %542 = vtanh.f32 %v428_v25 }
 0x230   :  { %v543_v27 = vpop.eup %542 }
 0x231   :  { %433 = vst.msk [vmem:[#allocation9] sm:$0x1] %vm432_vm0, %v543_v27 }
 0x232   :  { %609 = shalt.err (!%p606_p9)
}
 0x233   :  { %s610_s14 = scalar_lea.hbm %s738_s5, 16 }
 0x234   :  { %p611_p10 = scmp.ne.s32.totalorder %s738_s5, %s610_s14  ;;  %p614_p11 = scmp.lt.u32.totalorder %s610_s14, %s738_s5 }
 0x236   :  { %p616_p12 = pnand %p614_p11, %p611_p10 }
 0x238   :  { %619 = shalt.err (!%p616_p12)
}
 0x239   :  { %443 = dma.vmem_to_hbm [thread:$0]  %s441_s10, 16, %s738_s5, [#allocation4]  }
 0x23a   :  { %626 = dma.done.wait [#allocation4], 16  }
 0x23b   :  { %627 = vsyncadd [#allocation4], 4294967280 }
 0x23c   :  { %447 = vsyncpa [#allocation3], 1 }
 0x23d   :  { %448 = vsyncpa [#allocation8], 1 }
 0x23e   :  { %449 = vsyncpa [#allocation4], 1 }
 0x23f   :  { %450 = vsyncpa [#allocation5], 1 }

</bundles_post_ra>
